<compile_context>
chip_gen: v7x
topology: tpu7x:2x2x1
jax: 0.10.0
libtpu: 0.0.40
codegen_flags: <defaults>
</compile_context>

<pallas_src>
import math

import jax
import jax.numpy as jnp
from jax.experimental import pallas as pl
from jax.experimental.pallas import tpu as pltpu

_TARGET_TILE_BYTES = 4 << 20   # ~4 MiB/block -> ~16 MiB resident (2x in + 2x out buffers)
_VMEM_LIMIT_BYTES = 48 << 20   # enough on v5e/v6e; headroom under v7x's 64 MiB physical
_SMALL_COPY_BYTES = 4 << 20    # cap for the single-block VMEM fallback copy


# ---------------------------------------------------------------------------
# Kernels
# ---------------------------------------------------------------------------
def _alias_kernel(x_ref, o_ref):
    # Output buffer is aliased to the input buffer: no data movement needed.
    # touch() records a read/write dep so the (otherwise empty) call is kept.
    del x_ref
    pltpu.touch(o_ref)


def _copy_kernel(x_ref, o_ref):
    # Pure aligned copy; all reshaping happens (for free) in the wrapper.
    o_ref[...] = x_ref[...]


# ---------------------------------------------------------------------------
# Helpers
# ---------------------------------------------------------------------------
def _resolve_dim(d, ndim):
    return d + ndim if d < 0 else d


def _sublane_multiple(dtype):
    """Sublane packing multiple: 8 for f32, 16 for bf16, 32 for int8/fp8."""
    itemsize = int(jnp.dtype(dtype).itemsize)
    return max(8, 32 // max(itemsize, 1))


def _pick_lane_width(n):
    """Largest lane-dense (multiple of 128) column width that divides n."""
    for c in (2048, 1024, 512, 256, 128):
        if n % c == 0:
            return c
    return None


def _pick_block_rows(r, c, dtype):
    """Rows per block: ~4 MiB tiles, aligned to the dtype's sublane packing."""
    sub = _sublane_multiple(dtype)
    itemsize = int(jnp.dtype(dtype).itemsize)
    row_bytes = c * itemsize
    total_bytes = r * row_bytes
    target = max(sub, (_TARGET_TILE_BYTES // row_bytes) // sub * sub)

    if r <= target:
        block_rows = r                       # full dimension -> always a legal block dim
    else:
        block_rows = target                  # default: one masked trailing block
        lo = max(sub, (3 * target // 4) // sub * sub)
        for cand in range(target, lo - 1, -sub):
            if r % cand == 0:                # exact divisor only if >= 75% of target
                block_rows = cand
                break

    # v7x megacore: keep >= ~8 grid steps on big slabs so both TCs are fed.
    min_blocks = 8
    if total_bytes >= min_blocks * (512 << 10) and pl.cdiv(r, block_rows) < min_blocks:
        cap = max(sub, ((pl.cdiv(r, min_blocks) + sub - 1) // sub) * sub)
        block_rows = min(block_rows, cap)

    return block_rows


# ---------------------------------------------------------------------------
# Pallas call wrappers
# ---------------------------------------------------------------------------
def _aliased_identity(x):
    """Zero-data-movement identity: output aliases the input HBM buffer."""
    return pl.pallas_call(
        _alias_kernel,
        out_shape=jax.ShapeDtypeStruct(x.shape, x.dtype),
        in_specs=[pl.BlockSpec(memory_space=pl.ANY)],
        out_specs=pl.BlockSpec(memory_space=pl.ANY),
        input_output_aliases={0: 0},
    )(x)


def _tiled_copy_2d(x2d):
    """Pipelined lane-dense copy of a 2-D [R, C] slab (C % 128 == 0)."""
    r, c = x2d.shape
    itemsize = int(jnp.dtype(x2d.dtype).itemsize)
    block_rows = _pick_block_rows(r, c, x2d.dtype)
    grid = (pl.cdiv(r, block_rows),)
    return pl.pallas_call(
        _copy_kernel,
        out_shape=jax.ShapeDtypeStruct((r, c), x2d.dtype),
        grid=grid,
        in_specs=[pl.BlockSpec((block_rows, c), lambda i: (i, 0))],
        out_specs=pl.BlockSpec((block_rows, c), lambda i: (i, 0)),
        compiler_params=pltpu.CompilerParams(
            dimension_semantics=("parallel",),
            vmem_limit_bytes=_VMEM_LIMIT_BYTES),
        cost_estimate=pl.CostEstimate(
            flops=0, transcendentals=0,
            bytes_accessed=2 * r * c * itemsize),
    )(x2d)


def _whole_array_copy(x):
    """Single-block VMEM copy; only used for small (<= 4 MiB) awkward sizes."""
    itemsize = int(jnp.dtype(x.dtype).itemsize)
    return pl.pallas_call(
        _copy_kernel,
        out_shape=jax.ShapeDtypeStruct(x.shape, x.dtype),
        in_specs=[pl.BlockSpec(memory_space=pltpu.MemorySpace.VMEM)],
        out_specs=pl.BlockSpec(memory_space=pltpu.MemorySpace.VMEM),
        cost_estimate=pl.CostEstimate(
            flops=0, transcendentals=0,
            bytes_accessed=2 * x.size * itemsize),
    )(x)


def _flatten_copy(x, out_shape):
    """Explicit-copy flatten: tiled lane-dense HBM->HBM copy + free reshapes."""
    n = x.size
    itemsize = int(jnp.dtype(x.dtype).itemsize)
    c = _pick_lane_width(n)
    if c is None:
        if n * itemsize <= _SMALL_COPY_BYTES:
            return jnp.reshape(_whole_array_copy(x), out_shape)
        # TODO(synk): tile large non-128-divisible sizes (prefix + tail copy);
        # fall back to a metadata reshape for now.
        return jnp.reshape(x, out_shape)
    x2d = jnp.reshape(x, (n // c, c))          # free metadata reshape
    return jnp.reshape(_tiled_copy_2d(x2d), out_shape)


# ---------------------------------------------------------------------------
# Public entry point (torch.flatten semantics)
# ---------------------------------------------------------------------------
def flatten(x, start_dim, end_dim, copy=False):
    """Pallas equivalent of torch.flatten(x, start_dim, end_dim).

    Default path performs no data movement (output aliases the input buffer,
    matching torch's view semantics); pass copy=True for a fresh buffer.
    """
    ndim = x.ndim
    s = _resolve_dim(start_dim, ndim)
    e = _resolve_dim(end_dim, ndim)
    assert 0 <= s <= e < ndim, "invalid flatten dims"

    collapsed = math.prod(x.shape[s:e + 1]) if e >= s else 1
    out_shape = x.shape[:s] + (collapsed,) + x.shape[e + 1:]

    if x.size == 0:
        return jnp.reshape(x, out_shape)

    if copy:
        return _flatten_copy(x, out_shape)

    try:
        y = _aliased_identity(x)
    except Exception:  # robustness fallback: never fail just to save a copy
        return _flatten_copy(x, out_shape)
    return jnp.reshape(y, out_shape)           # free metadata reshape


if __name__ == "__main__":
    key = jax.random.PRNGKey(0)
    # Small NCHW-like input: batch=2, channels=4, H=W=16.
    x = jax.random.normal(key, (2, 4, 16, 16), dtype=jnp.float32)

    start_dim, end_dim = 1, 2                  # torch.flatten(x, 1, 2) -> (2, 64, 16)
    ref = jnp.reshape(x, (2, 4 * 16, 16))

    # Default zero-data-movement (aliased) path.
    out = flatten(x, start_dim, end_dim)
    jax.block_until_ready(out)
    assert out.shape == ref.shape, (out.shape, ref.shape)
    assert out.dtype == ref.dtype
    assert jnp.array_equal(out, ref), "aliased path mismatch vs reference reshape"

    # Explicit-copy path (tiled lane-dense HBM->HBM copy kernel).
    out_copy = flatten(x, start_dim, end_dim, copy=True)
    jax.block_until_ready(out_copy)
    assert out_copy.shape == ref.shape and out_copy.dtype == ref.dtype
    assert jnp.array_equal(out_copy, ref), "copy path mismatch vs reference reshape"

    # Negative-dim handling, matching torch.flatten(x, 0, -1).
    out_all = flatten(x, 0, -1)
    jax.block_until_ready(out_all)
    assert out_all.shape == (x.size,)
    assert jnp.array_equal(out_all, jnp.reshape(x, (-1,)))

    print("KERNEL_OK")
</pallas_src>

<mosaic_0001>
module attributes {stable_mosaic.version = 11 : i64} {
  func.func @_alias_kernel(%arg0: memref<2x4x16x16xf32, #tpu.memory_space<any>>, %arg1: memref<2x4x16x16xf32, #tpu.memory_space<any>>) attributes {dimension_semantics = [], scalar_prefetch = 0 : i64, scratch_operands = 0 : i64, tpu.core_type = #tpu.core_type<tc>} {
    return
  }
}

module attributes {stable_mosaic.version = 11 : i64} {
  func.func @_copy_kernel(%arg0: i32, %arg1: memref<1x2048xf32, #tpu.memory_space<vmem>>, %arg2: memref<1x2048xf32, #tpu.memory_space<vmem>>) attributes {dimension_semantics = [#tpu.dimension_semantics<parallel>], iteration_bounds = array<i64: 1>, scalar_prefetch = 0 : i64, scratch_operands = 0 : i64, tpu.core_type = #tpu.core_type<tc>, window_params = [{transform_indices = @transform_0, window_bounds = array<i64: 1, 2048>}, {transform_indices = @transform_1, window_bounds = array<i64: 1, 2048>}]} {
    %c0 = arith.constant 0 : index
    %c0_0 = arith.constant 0 : index
    %0 = vector.load %arg1[%c0, %c0_0] : memref<1x2048xf32, #tpu.memory_space<vmem>>, vector<1x2048xf32>
    %c0_1 = arith.constant 0 : index
    %c0_2 = arith.constant 0 : index
    %1 = vector.load %arg2[%c0_1, %c0_2] : memref<1x2048xf32, #tpu.memory_space<vmem>>, vector<1x2048xf32>
    tpu.vector_store %arg2[%c0_1, %c0_2], %0 {strides = array<i32>} : memref<1x2048xf32, #tpu.memory_space<vmem>>, vector<1x2048xf32>,
    return
  }
  func.func @transform_0(%arg0: i32) -> (i32, i32) {
    %c0_i32 = arith.constant 0 : i32
    %c0_i32_0 = arith.constant 0 : i32
    return %arg0, %c0_i32 : i32, i32
  }
  func.func @transform_1(%arg0: i32) -> (i32, i32) {
    %c0_i32 = arith.constant 0 : i32
    %c0_i32_0 = arith.constant 0 : i32
    return %arg0, %c0_i32 : i32, i32
  }
}

</mosaic_0001>

<bundles_post_ra>
// kernel: tpu_custom_call.1
= control target key start
LH: loop header
LB: loop body
LE: loop exit
PB: predicated region body
PF: predicated region fallthrough
CT: control target
= control target key end

     0   :  { %s16_s0 = inlined_call_operand.hbm [shape: f32[2,4,16,16], index: 0, kind: input, shape index: {}, may-alias: {0,1}]   ;;  %s17_s1 = inlined_call_operand.hbm [shape: f32[2,4,16,16], index: 1, kind: output, shape index: {}, may-alias: {0,1}]  }

// kernel: tpu_custom_call.1
= control target key start
LH: loop header
LB: loop body
LE: loop exit
PB: predicated region body
PF: predicated region fallthrough
CT: control target
= control target key end

     0   :  { %6 = vsyncpa [#allocation3], 0  ;;  %s126_s0 = inlined_call_operand.hbm [shape: f32[1,2048], index: 0, kind: input, shape index: {}]   ;;  %s127_s1 = inlined_call_operand.hbm [shape: f32[1,2048], index: 1, kind: output, shape index: {}]  }
   0x1   :  { %7 = vsyncpa [#allocation4], 0  ;;  %s90_s6 = smov [#allocation2]   ;;  %s42_s10 = scalar_lea.hbm %s126_s0, 256 }
   0x2   :  { %s14_s7 = sshll.u32 %s90_s6, 4  ;;  %p43_p0 = scmp.ne.s32.totalorder %s126_s0, %s42_s10  ;;  %s15_s7 = int_to_ptr.vmem [resolvable:$true] %s14_s7 }
   0x3   :  { %p46_p1 = scmp.lt.u32.totalorder %s42_s10, %s126_s0 }
   0x5   :  { %p48_p2 = pnand %p46_p1, %p43_p0 }
   0x7   :  { %51 = shalt.err (!%p48_p2)
}
   0x8   :  { %s52_s15 = scalar_lea.vmem %s15_s7, 256  ;;  %p57_p4 = scmp.lt.s32.totalorder %s15_s7, %s15_s7 }
   0x9   :  { %p53_p3 = scmp.ne.s32.totalorder %s15_s7, %s52_s15  ;;  %p58_p5 = scmp.lt.s32.totalorder %s52_s15, %s52_s15 }
   0xb   :  { %p59_p6 = por %p58_p5, %p57_p4 }
   0xd   :  { %p60_p7 = pnand %p59_p6, %p53_p3 }
   0xf   :  { %63 = shalt.err (!%p60_p7)
}
  0x10   :  { %17 = dma.hbm_to_vmem [thread:$0]  %s126_s0, 256, %s15_s7, [#allocation3]  }
  0x11   :  { %86 = dma.done.wait [#allocation3], 256  }
  0x12   :  { %87 = vsyncadd [#allocation3], 4294967040  ;;  %s91_s18 = smov [#allocation5]   ;;  %v21_v0 = vld [vmem:[#allocation2] sm:$0xff]  ;;  %v22_v1 = vld [vmem:[#allocation2 + $0x8] sm:$0xff] }
  0x13   :  { %s31_s19 = sshll.u32 %s91_s18, 4  ;;  %23 = vst [vmem:[#allocation5] sm:$0xff] %v21_v0  ;;  %24 = vst [vmem:[#allocation5 + $0x8] sm:$0xff] %v22_v1  ;;  %s32_s19 = int_to_ptr.vmem [resolvable:$true] %s31_s19 }
  0x14   :  { %s64_s20 = scalar_lea.vmem %s32_s19, 256  ;;  %p69_p9 = scmp.lt.s32.totalorder %s32_s19, %s32_s19 }
  0x15   :  { %p65_p8 = scmp.ne.s32.totalorder %s32_s19, %s64_s20  ;;  %p70_p10 = scmp.lt.s32.totalorder %s64_s20, %s64_s20 }
  0x17   :  { %p71_p11 = por %p70_p10, %p69_p9 }
  0x19   :  { %p72_p12 = pnand %p71_p11, %p65_p8 }
  0x1b   :  { %75 = shalt.err (!%p72_p12)
}
  0x1c   :  { %s76_s0 = scalar_lea.hbm %s127_s1, 256 }
  0x1d   :  { %p77_p13 = scmp.ne.s32.totalorder %s127_s1, %s76_s0  ;;  %p80_p0 = scmp.lt.u32.totalorder %s76_s0, %s127_s1 }
  0x1f   :  { %p82_p1 = pnand %p80_p0, %p77_p13 }
  0x21   :  { %85 = shalt.err (!%p82_p1)
}
  0x22   :  { %34 = dma.vmem_to_hbm [thread:$0]  %s32_s19, 256, %s127_s1, [#allocation4]  }
  0x23   :  { %88 = dma.done.wait [#allocation4], 256  }
  0x24   :  { %89 = vsyncadd [#allocation4], 4294967040 }
  0x25   :  { %38 = vsyncpa [#allocation3], 1 }
  0x26   :  { %39 = vsyncpa [#allocation4], 1 }

</bundles_post_ra>
